<compile_context>
chip_gen: v7x
topology: tpu7x:2x2x1
jax: 0.10.0
libtpu: 0.0.40
codegen_flags: <defaults>
</compile_context>

<pallas_src>
import functools

import jax
import jax.numpy as jnp
from jax.experimental import pallas as pl
from jax.experimental.pallas import tpu as pltpu


def _or_fold_rows(m, target_rows):
    """OR-fold the leading (sublane) axis of m [r, 128] down to min(r, target_rows) rows.

    Uses overlapping halves (OR is idempotent), so it works for any r and needs only
    static slices + elementwise ORs -- ~1 VPU op per input vreg in total.
    """
    r = m.shape[0]
    while r > target_rows:
        half = max(target_rows, (r + 1) // 2)
        m = m[:half] | m[r - half:r]
        r = half
    return m


def _presence_mask_kernel(t_ref, mask_ref, *, num_classes, ignore_label,
                          rows, rows_tile, needs_row_mask):
    """Accumulate a per-image class-presence bitmask.

    t_ref:    (1, rows_tile, 128) integer labels (one image, one row chunk)
    mask_ref: (1, <=8, 128) int32 output block; bit c of the OR over all its elements
              is 1 iff class c is present in the image.
    """
    p = pl.program_id(1)

    @pl.when(p == 0)
    def _():
        mask_ref[...] = jnp.zeros_like(mask_ref)

    t = t_ref[0].astype(jnp.int32)                       # [rows_tile, 128]
    # valid pixel: 0 <= label < num_classes and label != ignore_label.
    # (labels >= num_classes that are not ignore_label would crash the PyTorch reference;
    #  here they are simply treated as absent.)
    valid = (t >= 0) & (t < num_classes)
    if 0 <= ignore_label < num_classes:                  # static check; 250 >= 19 skips it
        valid = valid & (t != ignore_label)
    if needs_row_mask:
        # Last chunk of the row axis may extend past `rows`: mask the garbage rows.
        row = jax.lax.broadcasted_iota(jnp.int32, t.shape, 0)
        valid = valid & (row < (rows - p * rows_tile))

    # One class bit per pixel: invalid pixels contribute 0 (0 << anything == 0);
    # `& 31` keeps the shift amount in range for out-of-range / negative labels.
    bits = valid.astype(jnp.int32) << (t & 31)           # [rows_tile, 128] int32

    # Sublane OR-fold to the accumulator height, then elementwise OR into the output.
    mask_ref[0] = mask_ref[0] | _or_fold_rows(bits, mask_ref.shape[1])


def semantic_encoding_loss(predictions, targets, *, num_classes=19, ignore_label=250,
                           weight=None, alpha=0.25, max_tile_rows=4096):
    """predictions: [N, num_classes] float logits, targets: [N, H, W] int labels."""
    n = targets.shape[0]
    hw = 1
    for d in targets.shape[1:]:
        hw *= d
    assert predictions.shape == (n, num_classes)
    # Single int32 presence word per image.
    # TODO(synk): use two mask words for num_classes > 31.
    assert num_classes <= 31

    # Lane-dense layout [N, rows, 128]; a contiguous reshape costs no HBM pass.
    if hw % 128 == 0:
        t3 = targets.reshape(n, hw // 128, 128)
    else:
        # TODO(synk): ragged lane tail costs one pad pass; only hit when H*W % 128 != 0.
        pad = (-hw) % 128
        t3 = jnp.pad(targets.reshape(n, hw), ((0, 0), (0, pad)),
                     constant_values=-1).reshape(n, -1, 128)
    rows = t3.shape[1]

    # max_tile_rows = 8 * 2^k -> ~2 MiB int32 per block, aligned halving folds,
    # double-buffered input + temps stay well under the 32 MiB scoped VMEM limit.
    rows_tile = rows if rows <= max_tile_rows else max_tile_rows
    num_chunks = pl.cdiv(rows, rows_tile)
    needs_row_mask = (rows % rows_tile) != 0
    acc_rows = min(8, rows_tile)

    kernel = functools.partial(
        _presence_mask_kernel,
        num_classes=num_classes, ignore_label=ignore_label,
        rows=rows, rows_tile=rows_tile, needs_row_mask=needs_row_mask)

    mask = pl.pallas_call(
        kernel,
        out_shape=jax.ShapeDtypeStruct((n, acc_rows, 128), jnp.int32),
        grid_spec=pltpu.PrefetchScalarGridSpec(
            num_scalar_prefetch=0,
            grid=(n, num_chunks),
            in_specs=[pl.BlockSpec((1, rows_tile, 128), lambda i, p: (i, p, 0))],
            out_specs=pl.BlockSpec((1, acc_rows, 128), lambda i, p: (i, 0, 0)),
        ),
        compiler_params=pltpu.CompilerParams(
            dimension_semantics=("parallel", "arbitrary"),   # images parallel (v7x 2 TCs)
            vmem_limit_bytes=32 * 1024 * 1024,
        ),
    )(t3)

    # O(N*C) finish in plain JAX (tiny; per the perf review this is free in XLA).
    class_bits = jnp.asarray([1 << c for c in range(num_classes)], dtype=jnp.int32)
    enc = (jnp.bitwise_and(mask[..., None], class_bits) != 0).any(axis=(1, 2))
    enc = enc.astype(jnp.float32)                             # [N, C] presence one-hot

    x = predictions.astype(jnp.float32)
    per = jnp.maximum(x, 0.0) - x * enc + jnp.log1p(jnp.exp(-jnp.abs(x)))
    if weight is not None:
        per = per * jnp.asarray(weight, jnp.float32)
    return alpha * jnp.mean(per)


def _reference_loss(predictions, targets, *, num_classes=19, ignore_label=250, alpha=0.25):
    valid = (targets >= 0) & (targets != ignore_label)
    tv = jnp.where(valid, targets, -1)
    enc = (tv[..., None] == jnp.arange(num_classes)).any(axis=(1, 2)).astype(jnp.float32)
    x = predictions.astype(jnp.float32)
    per = jnp.maximum(x, 0.0) - x * enc + jnp.log1p(jnp.exp(-jnp.abs(x)))
    return alpha * jnp.mean(per)


if __name__ == "__main__":
    num_classes = 19
    ignore_label = 250
    alpha = 0.25
    N, H, W = 2, 16, 16

    key = jax.random.PRNGKey(0)
    k1, k2, k3, k4 = jax.random.split(key, 4)
    predictions = jax.random.normal(k1, (N, num_classes), dtype=jnp.float32)
    targets = jax.random.randint(k2, (N, H, W), 0, num_classes, dtype=jnp.int32)
    # sprinkle ignore_label and negative labels to exercise the valid-pixel masking
    ignore_mask = jax.random.bernoulli(k3, 0.1, (N, H, W))
    targets = jnp.where(ignore_mask, ignore_label, targets)
    neg_mask = jax.random.bernoulli(k4, 0.05, (N, H, W))
    targets = jnp.where(neg_mask, -1, targets).astype(jnp.int32)

    loss_fn = jax.jit(functools.partial(
        semantic_encoding_loss,
        num_classes=num_classes, ignore_label=ignore_label, alpha=alpha))
    loss = jax.block_until_ready(loss_fn(predictions, targets))

    ref = _reference_loss(
        predictions, targets,
        num_classes=num_classes, ignore_label=ignore_label, alpha=alpha)
    assert jnp.allclose(loss, ref, atol=1e-5, rtol=1e-5), (loss, ref)

    print("KERNEL_OK")
</pallas_src>

<mosaic_0001>
module attributes {stable_mosaic.version = 11 : i64} {
  func.func @_presence_mask_kernel(%arg0: i32, %arg1: i32, %arg2: memref<1x2x128xi32, #tpu.memory_space<vmem>>, %arg3: memref<1x2x128xi32, #tpu.memory_space<vmem>>) attributes {dimension_semantics = [#tpu.dimension_semantics<parallel>, #tpu.dimension_semantics<arbitrary>], iteration_bounds = array<i64: 2, 1>, scalar_prefetch = 0 : i64, scratch_operands = 0 : i64, tpu.core_type = #tpu.core_type<tc>, window_params = [{transform_indices = @transform_0, window_bounds = array<i64: 1, 2, 128>}, {transform_indices = @transform_1, window_bounds = array<i64: 1, 2, 128>}]} {
    %c0_i32 = arith.constant 0 : i32
    %0 = arith.cmpi eq, %arg1, %c0_i32 : i32
    %1 = arith.extui %0 : i1 to i32
    %c0_i32_0 = arith.constant 0 : i32
    %2 = arith.cmpi ne, %1, %c0_i32_0 : i32
    scf.if %2 {
      %c0_i32_10 = arith.constant 0 : i32
      %20 = vector.broadcast %c0_i32_10 : i32 to vector<1x2x128xi32>
      %c0_11 = arith.constant 0 : index
      %c0_12 = arith.constant 0 : index
      %c0_13 = arith.constant 0 : index
      %21 = vector.load %arg3[%c0_11, %c0_12, %c0_13] : memref<1x2x128xi32, #tpu.memory_space<vmem>>, vector<1x2x128xi32>
      tpu.vector_store %arg3[%c0_11, %c0_12, %c0_13], %20 {strides = array<i32>} : memref<1x2x128xi32, #tpu.memory_space<vmem>>, vector<1x2x128xi32>,
    } else {
    }
    %c0 = arith.constant 0 : index
    %c0_1 = arith.constant 0 : index
    %c0_2 = arith.constant 0 : index
    %3 = vector.load %arg2[%c0, %c0_1, %c0_2] : memref<1x2x128xi32, #tpu.memory_space<vmem>>, vector<1x2x128xi32>
    %4 = vector.shape_cast %3 : vector<1x2x128xi32> to vector<2x128xi32>
    %c0_i32_3 = arith.constant 0 : i32
    %5 = vector.broadcast %c0_i32_3 : i32 to vector<2x128xi32>
    %6 = arith.cmpi sge, %4, %5 : vector<2x128xi32>
    %c19_i32 = arith.constant 19 : i32
    %7 = vector.broadcast %c19_i32 : i32 to vector<2x128xi32>
    %8 = arith.cmpi slt, %4, %7 : vector<2x128xi32>
    %9 = arith.andi %6, %8 : vector<2x128xi1>
    %10 = arith.extui %9 : vector<2x128xi1> to vector<2x128xi32>
    %c31_i32 = arith.constant 31 : i32
    %11 = vector.broadcast %c31_i32 : i32 to vector<2x128xi32>
    %12 = arith.andi %4, %11 : vector<2x128xi32>
    %13 = arith.shli %10, %12 : vector<2x128xi32>
    %c0_4 = arith.constant 0 : index
    %c0_5 = arith.constant 0 : index
    %c0_6 = arith.constant 0 : index
    %14 = vector.load %arg3[%c0_4, %c0_5, %c0_6] : memref<1x2x128xi32, #tpu.memory_space<vmem>>, vector<1x2x128xi32>
    %15 = vector.shape_cast %14 : vector<1x2x128xi32> to vector<2x128xi32>
    %16 = arith.ori %15, %13 : vector<2x128xi32>
    %c0_7 = arith.constant 0 : index
    %c0_8 = arith.constant 0 : index
    %c0_9 = arith.constant 0 : index
    %17 = vector.load %arg3[%c0_7, %c0_8, %c0_9] : memref<1x2x128xi32, #tpu.memory_space<vmem>>, vector<1x2x128xi32>
    %18 = vector.shape_cast %17 : vector<1x2x128xi32> to vector<2x128xi32>
    %19 = vector.shape_cast %16 : vector<2x128xi32> to vector<1x2x128xi32>
    tpu.vector_store %arg3[%c0_7, %c0_8, %c0_9], %19 {strides = array<i32>} : memref<1x2x128xi32, #tpu.memory_space<vmem>>, vector<1x2x128xi32>,
    return
  }
  func.func @transform_0(%arg0: i32, %arg1: i32) -> (i32, i32, i32) {
    %c0_i32 = arith.constant 0 : i32
    %c0_i32_0 = arith.constant 0 : i32
    return %arg0, %arg1, %c0_i32 : i32, i32, i32
  }
  func.func @transform_1(%arg0: i32, %arg1: i32) -> (i32, i32, i32) {
    %c0_i32 = arith.constant 0 : i32
    %c0_i32_0 = arith.constant 0 : i32
    %c0_i32_1 = arith.constant 0 : i32
    return %arg0, %c0_i32, %c0_i32_0 : i32, i32, i32
  }
}

</mosaic_0001>

<bundles_post_ra>
// kernel: semantic_encoding_loss.1
= control target key start
LH: loop header
LB: loop body
LE: loop exit
PB: predicated region body
PF: predicated region fallthrough
CT: control target
= control target key end

     0   :  { %s283_s6 = smov 0   ;;  %s285_s7 = smov 0   ;;  %s309_s0 = inlined_call_operand.vmem [shape: s32[2,2,128], index: 0, kind: input, shape index: {}]   ;;  %s310_s1 = inlined_call_operand.vmem [shape: s32[2,2,128], index: 1, kind: output, shape index: {}]  }
   0x1   :  { %s287_s8 = smov 0  }
   0x2 LB: > { %s23_s9 = sadd.s32 1, %s266_s7  ;;  %p218_p0 = scmp.ge.s32.totalorder %s270_s8, 1  ;;  %s270_s8 = sphi %s287_s8, %s11_s8   ;;  %s266_s7 = sphi %s285_s7, %s312_s7   ;;  %s262_s6 = sphi %s283_s6, %s311_s6  }
   0x3   : > { %p25_p1 = scmp.ge.s32.totalorder %s23_s9, 2  ;;  %p103_p2 = scmp.lt.s32.totalorder %s270_s8, 3 }
   0x5   : > { %s314_s9 = smov (%p25_p1, %s23_s9), 0  ;;  %p104_p3 = pnand %p218_p0, %p103_p2 }
   0x6   : > { %p124_p4 = scmp.lt.s32.totalorder (!%p104_p3), %s262_s6, 1  ;;  %v272_v0 = vmov (!%p104_p3), 0  }
   0x7   : > { %107 = sbr.rel (%p104_p3) target bundleno = 28 (0x1c), region = 24 }
   0xe   : > { %s316_s6 = smov (!%p124_p4, %s262_s6), 1 }
   0xf   : > { %s219_s10 = sshll.u32 %s316_s6, 1 }
  0x10   : > { %s130_s13 = scalar_lea.vmem %s309_s0, %s219_s10  ;;  %s134_s16 = scalar_lea.vmem %s310_s1, %s219_s10 }
  0x11   : > { %139 = vst [vmem:[%s134_s16] sm:$0x3] %v272_v0  ;;  %v140_v1 = vld [vmem:[%s130_s13] sm:$0x3] }
  0x12   : > { %vm141_vm0 = vcmp.ge.s32.totalorder %v140_v1, 0  ;;  %vm142_vm1 = vcmp.lt.s32.totalorder %v140_v1, 19  ;;  %v145_v2 = vand.u32 31, %v140_v1 }
  0x13   : > { %vm143_vm2 = vmand %vm141_vm0, %vm142_vm1 }
  0x14   : > { %v144_v3 = vsel %vm143_vm2, 1, %v272_v0 }
  0x15   : > { %v146_v4 = vshll.u32 %v144_v3, %v145_v2 }
  0x18   : > { %v147_v5 = vld [vmem:[%s134_s16] sm:$0x3] }
  0x19   : > { %v148_v6 = vor.u32 %v147_v5, %v146_v4 }
  0x1b   : > { %149 = vst [vmem:[%s134_s16] sm:$0x3] %v148_v6 }
  0x1c PF: > { %s11_s8 = sadd.s32 1, %s270_s8   ;;  %s311_s6 = smov %s266_s7 }
  0x1d   : > { %p8_p5 = scmp.ge.s32.totalorder %s11_s8, 4   ;;  %s312_s7 = smov %s314_s9 }
  0x1f   :  { %10 = sbr.rel (!%p8_p5) target bundleno = 2 (0x2), region = 58 }

</bundles_post_ra>
